<compile_context>
chip_gen: v7x
topology: tpu7x:2x2x1
jax: 0.10.0
libtpu: 0.0.40
codegen_flags: <defaults>
</compile_context>

<pallas_src>
import numpy as np
import jax
import jax.numpy as jnp
from jax.experimental import pallas as pl
from jax.experimental.pallas import tpu as pltpu


def _round_up(x, m):
    return ((x + m - 1) // m) * m


def _pad_to(x, shape):
    pads = [(0, s - d) for d, s in zip(x.shape, shape)]
    if all(p == (0, 0) for p in pads):
        return x
    return jnp.pad(x, pads)


# -----------------------------------------------------------------------------
# Plain-JAX glue (data-dependent indexing).
# -----------------------------------------------------------------------------
def square_distance(src, dst):
    # src: [B, M, 3], dst: [B, N, 3] -> [B, M, N]
    return jnp.sum((src[:, :, None, :] - dst[:, None, :, :]) ** 2, axis=-1)


def index_points(points, idx):
    # points: [B, N, C], idx: [B, ...] -> [B, ..., C]
    B = points.shape[0]
    batch = jnp.arange(B).reshape((B,) + (1,) * (idx.ndim - 1))
    return points[batch, idx]


def knn_indices(xyz, k):
    # Nearest-first neighbour indices; equals argsort(dists)[..., :k] for
    # distinct distances but avoids the O(N^2 log N) full sort.
    dists = square_distance(xyz, xyz)
    _, idx = jax.lax.top_k(-dists, k)
    return idx


# -----------------------------------------------------------------------------
# Kernel 1: fused input projections   q|k|v = feat @ [Wq'|Wk'|Wv'] + [bq|bk|bv]
# (fc1 folded into the projection weights host-side; single MXU dot, N = 3*dm).
# -----------------------------------------------------------------------------
def _proj_kernel(feat_ref, wqkv_ref, bqkv_ref, q_ref, k_ref, v_ref):
    dm = q_ref.shape[-1]
    y = jnp.dot(feat_ref[...].astype(jnp.bfloat16), wqkv_ref[...],
                preferred_element_type=jnp.float32) + bqkv_ref[...]
    q_ref[...] = y[:, :dm]
    k_ref[...] = y[:, dm:2 * dm].astype(jnp.bfloat16)   # bf16 -> halves HBM traffic
    v_ref[...] = y[:, 2 * dm:3 * dm].astype(jnp.bfloat16)


def projections_pallas(feat, wqkv, bqkv, dm, t_rows=128):
    """feat: [R, dp_pad] f32 -> (q f32, k bf16, v bf16), each [R, dm]."""
    R, dp = feat.shape
    r_pad = _round_up(R, t_rows)
    feat = _pad_to(feat, (r_pad, dp))
    n3 = wqkv.shape[1]

    cost = pl.CostEstimate(
        flops=int(2 * r_pad * dp * n3),
        transcendentals=0,
        bytes_accessed=int(r_pad * dp * 4 + wqkv.size * 2 + bqkv.size * 4
                           + r_pad * dm * 4 + 2 * r_pad * dm * 2))

    q, kx, vx = pl.pallas_call(
        _proj_kernel,
        out_shape=[jax.ShapeDtypeStruct((r_pad, dm), jnp.float32),
                   jax.ShapeDtypeStruct((r_pad, dm), jnp.bfloat16),
                   jax.ShapeDtypeStruct((r_pad, dm), jnp.bfloat16)],
        grid=(r_pad // t_rows,),
        in_specs=[pl.BlockSpec((t_rows, dp), lambda i: (i, 0)),
                  pl.BlockSpec(wqkv.shape, lambda i: (0, 0)),
                  pl.BlockSpec(bqkv.shape, lambda i: (0, 0))],
        out_specs=[pl.BlockSpec((t_rows, dm), lambda i: (i, 0)),
                   pl.BlockSpec((t_rows, dm), lambda i: (i, 0)),
                   pl.BlockSpec((t_rows, dm), lambda i: (i, 0))],
        compiler_params=pltpu.CompilerParams(
            dimension_semantics=("parallel",),
            vmem_limit_bytes=32 * 1024 * 1024),
        cost_estimate=cost,
    )(feat, wqkv, bqkv)
    return q[:R], kx[:R], vx[:R]


# -----------------------------------------------------------------------------
# Kernel 2: pos-enc MLP, gamma MLP (scale pre-folded), softmax over K,
#           aggregation, fc2 + residual.
# -----------------------------------------------------------------------------
def _attn_kernel(q_ref, k_ref, v_ref, rel_ref, pre_ref,
                 wd1_ref, bd1_ref, wd2_ref, bd2_ref,
                 wg1_ref, bg1_ref, wg2_ref, bg2_ref,
                 w2_ref, b2_ref,
                 out_ref, attn_ref):
    t, kk, dm = k_ref.shape

    # fc_delta positional encoding: Linear(3->dm) -> ReLU -> Linear(dm->dm)
    rel = rel_ref[...].reshape(t * kk, rel_ref.shape[-1]).astype(jnp.bfloat16)
    h = jnp.dot(rel, wd1_ref[...], preferred_element_type=jnp.float32)
    h = jnp.maximum(h + bd1_ref[...], 0.0)
    pos = jnp.dot(h.astype(jnp.bfloat16), wd2_ref[...],
                  preferred_element_type=jnp.float32) + bd2_ref[...]
    pos = pos.reshape(t, kk, dm)

    # fc_gamma on (q - k + pos): Linear -> ReLU -> Linear
    # (1/sqrt(d_model) is already folded into wg2 / bg2 host-side)
    diff = q_ref[...][:, None, :] - k_ref[...].astype(jnp.float32) + pos
    g = jnp.dot(diff.reshape(t * kk, dm).astype(jnp.bfloat16), wg1_ref[...],
                preferred_element_type=jnp.float32)
    g = jnp.maximum(g + bg1_ref[...], 0.0)
    logits = (jnp.dot(g.astype(jnp.bfloat16), wg2_ref[...],
                      preferred_element_type=jnp.float32)
              + bg2_ref[...]).reshape(t, kk, dm)

    # softmax over the neighbour axis (axis=1 here, dim=-2 in PyTorch)
    m = jnp.max(logits, axis=1, keepdims=True)
    e = jnp.exp(logits - m)
    s = jnp.sum(e, axis=1, keepdims=True)
    attn = e * pl.reciprocal(s, approx=False)   # exact; keeps row-sum ~= 1
    attn_ref[...] = attn.astype(attn_ref.dtype)

    # res = sum_K attn * (v + pos);  out = fc2(res) + residual
    res = jnp.sum(attn * (v_ref[...].astype(jnp.float32) + pos), axis=1)
    out_ref[...] = (jnp.dot(res.astype(jnp.bfloat16), w2_ref[...],
                            preferred_element_type=jnp.float32)
                    + b2_ref[...] + pre_ref[...])


def vector_attention_pallas(q, kg, vg, rel, pre, params, t_rows=128):
    """q:[R,dm_p] f32, kg/vg:[R,K,dm_p] bf16, rel:[R,K,rp] f32, pre:[R,dp_p] f32
       -> (out [R,dp_p] f32, attn [R,K,dm_p] bf16)."""
    R, K, dm = kg.shape
    dp = pre.shape[-1]
    rp = rel.shape[-1]
    r_pad = _round_up(R, t_rows)
    q = _pad_to(q, (r_pad, dm))
    kg = _pad_to(kg, (r_pad, K, dm))
    vg = _pad_to(vg, (r_pad, K, dm))
    rel = _pad_to(rel, (r_pad, K, rp))
    pre = _pad_to(pre, (r_pad, dp))

    in_specs = [
        pl.BlockSpec((t_rows, dm), lambda i: (i, 0)),          # q
        pl.BlockSpec((t_rows, K, dm), lambda i: (i, 0, 0)),    # gathered k (bf16)
        pl.BlockSpec((t_rows, K, dm), lambda i: (i, 0, 0)),    # gathered v (bf16)
        pl.BlockSpec((t_rows, K, rp), lambda i: (i, 0, 0)),    # relative xyz
        pl.BlockSpec((t_rows, dp), lambda i: (i, 0)),          # residual (pre)
    ] + [pl.BlockSpec(p.shape, lambda i: (0, 0)) for p in params]
    out_specs = [
        pl.BlockSpec((t_rows, dp), lambda i: (i, 0)),          # out
        pl.BlockSpec((t_rows, K, dm), lambda i: (i, 0, 0)),    # attn (bf16)
    ]
    out_shape = [jax.ShapeDtypeStruct((r_pad, dp), jnp.float32),
                 jax.ShapeDtypeStruct((r_pad, K, dm), jnp.bfloat16)]

    rows = r_pad * K
    w_bytes = int(sum(int(p.size) * p.dtype.itemsize for p in params))
    cost = pl.CostEstimate(
        flops=int(2 * rows * (rp * dm + 3 * dm * dm) + 2 * r_pad * dm * dp),
        transcendentals=int(rows * dm),
        bytes_accessed=int(q.size * 4 + kg.size * 2 + vg.size * 2
                           + rel.size * 4 + pre.size * 4 + w_bytes
                           + r_pad * dp * 4 + rows * dm * 2))

    out, attn = pl.pallas_call(
        _attn_kernel,
        out_shape=out_shape,
        grid=(r_pad // t_rows,),
        in_specs=in_specs,
        out_specs=out_specs,
        compiler_params=pltpu.CompilerParams(
            dimension_semantics=("parallel",),
            vmem_limit_bytes=64 * 1024 * 1024),
        cost_estimate=cost,
    )(q, kg, vg, rel, pre, *params)
    return out[:R], attn[:R]


# -----------------------------------------------------------------------------
# Module
# -----------------------------------------------------------------------------
class TransformerBlock:
    LANE = 128   # pad channel dims to full 128-lane vregs (lane-dense stores)
    REL_PAD = 8  # pad the 3-wide relative-position input to a clean sublane count

    def __init__(self, d_points, d_model, k, key=None):
        self.d_points = d_points
        self.d_model = d_model
        self.k = k
        if key is None:
            key = jax.random.PRNGKey(42)

        def lin(kk_, fan_in, fan_out, bias=True):
            kw, kb = jax.random.split(kk_)
            w = 0.1 * jax.random.normal(kw, (fan_in, fan_out), jnp.float32)
            b = (0.1 * jax.random.normal(kb, (fan_out,), jnp.float32)
                 if bias else None)
            return w, b

        keys = jax.random.split(key, 9)
        self.w1, self.b1 = lin(keys[0], d_points, d_model)      # fc1
        self.w2, self.b2 = lin(keys[1], d_model, d_points)      # fc2
        self.wd1, self.bd1 = lin(keys[2], 3, d_model)           # fc_delta[0]
        self.wd2, self.bd2 = lin(keys[3], d_model, d_model)     # fc_delta[2]
        self.wg1, self.bg1 = lin(keys[4], d_model, d_model)     # fc_gamma[0]
        self.wg2, self.bg2 = lin(keys[5], d_model, d_model)     # fc_gamma[2]
        self.wq, _ = lin(keys[6], d_model, d_model, bias=False)  # w_qs
        self.wk, _ = lin(keys[7], d_model, d_model, bias=False)  # w_ks
        self.wv, _ = lin(keys[8], d_model, d_model, bias=False)  # w_vs

        # ---- lane-padded / bf16 parameter copies used by the kernels --------
        dm_p = _round_up(d_model, self.LANE)
        dp_p = _round_up(d_points, self.LANE)
        self.dm_pad, self.dp_pad = dm_p, dp_p

        def padw(w, r, c, dtype=jnp.bfloat16):
            return _pad_to(w, (r, c)).astype(dtype)

        def padb(b, c):
            return _pad_to(b.reshape(1, -1), (1, c)).astype(jnp.float32)

        # fc1 folded into q/k/v (no activation between fc1 and the projections):
        #   q = (feat @ w1 + b1) @ wq = feat @ (w1 @ wq) + (b1 @ wq)
        # and the three projections are concatenated so kernel 1 issues ONE
        # (dp_pad, 3*dm_pad) matmul.
        wq_f, bq_f = self.w1 @ self.wq, self.b1 @ self.wq
        wk_f, bk_f = self.w1 @ self.wk, self.b1 @ self.wk
        wv_f, bv_f = self.w1 @ self.wv, self.b1 @ self.wv
        self.p_wqkv = jnp.concatenate(
            [padw(wq_f, dp_p, dm_p), padw(wk_f, dp_p, dm_p),
             padw(wv_f, dp_p, dm_p)], axis=1)
        self.p_bqkv = jnp.concatenate(
            [padb(bq_f, dm_p), padb(bk_f, dm_p), padb(bv_f, dm_p)], axis=1)

        # 1/sqrt(d_model) softmax scale folded into the gamma second layer.
        inv_sqrt_d = np.float32(1.0 / np.sqrt(d_model))

        self.p_wd1 = padw(self.wd1, self.REL_PAD, dm_p)
        self.p_bd1 = padb(self.bd1, dm_p)
        self.p_wd2 = padw(self.wd2, dm_p, dm_p)
        self.p_bd2 = padb(self.bd2, dm_p)
        self.p_wg1 = padw(self.wg1, dm_p, dm_p)
        self.p_bg1 = padb(self.bg1, dm_p)
        self.p_wg2 = padw(self.wg2 * inv_sqrt_d, dm_p, dm_p)
        self.p_bg2 = padb(self.bg2 * inv_sqrt_d, dm_p)
        self.p_w2 = padw(self.w2, dm_p, dp_p)
        self.p_b2 = padb(self.b2, dp_p)

    def __call__(self, xyz, features):
        B, N, _ = xyz.shape
        K = self.k
        dm_p, dp_p = self.dm_pad, self.dp_pad

        # --- data-dependent kNN construction & gathers (plain JAX glue) ------
        knn_idx = knn_indices(xyz, K)                                 # [B, N, K]
        knn_xyz = index_points(xyz, knn_idx)                          # [B, N, K, 3]
        rel = xyz[:, :, None, :] - knn_xyz                            # [B, N, K, 3]
        rel = _pad_to(rel, (B, N, K, self.REL_PAD))

        feat = _pad_to(features.astype(jnp.float32).reshape(B * N, -1),
                       (B * N, dp_p))                                 # [R, dp_pad]

        # --- Pallas kernel 1: fused fc1+q/k/v projection (k/v emitted bf16) ---
        q, kx, vx = projections_pallas(feat, self.p_wqkv, self.p_bqkv, dm_p)

        # --- gather neighbour keys/values (data-dependent, plain JAX; bf16) ---
        k_g = index_points(kx.reshape(B, N, dm_p), knn_idx).reshape(B * N, K, dm_p)
        v_g = index_points(vx.reshape(B, N, dm_p), knn_idx).reshape(B * N, K, dm_p)
        rel_flat = rel.reshape(B * N, K, self.REL_PAD)

        # --- Pallas kernel 2: pos-enc MLP, gamma MLP, softmax-over-K, fc2 -----
        params = (self.p_wd1, self.p_bd1, self.p_wd2, self.p_bd2,
                  self.p_wg1, self.p_bg1, self.p_wg2, self.p_bg2,
                  self.p_w2, self.p_b2)
        out_p, attn_p = vector_attention_pallas(q, k_g, v_g, rel_flat, feat,
                                                params)

        res = out_p[:, :self.d_points].reshape(B, N, self.d_points)
        attn = attn_p[:, :, :self.d_model].astype(jnp.float32).reshape(
            B, N, K, self.d_model)
        return res, attn

    # Pure-JAX f32 reference of the PyTorch forward (correctness oracle).
    def reference(self, xyz, features):
        knn_idx = knn_indices(xyz, self.k)
        knn_xyz = index_points(xyz, knn_idx)
        pre = features
        x = features @ self.w1 + self.b1
        q = x @ self.wq
        kk = index_points(x @ self.wk, knn_idx)
        v = index_points(x @ self.wv, knn_idx)
        rel = xyz[:, :, None, :] - knn_xyz
        pos = jnp.maximum(rel @ self.wd1 + self.bd1, 0.0) @ self.wd2 + self.bd2
        g = jnp.maximum((q[:, :, None, :] - kk + pos) @ self.wg1 + self.bg1, 0.0)
        g = g @ self.wg2 + self.bg2
        attn = jax.nn.softmax(g / np.sqrt(self.d_model), axis=-2)
        res = jnp.einsum('bmnf,bmnf->bmf', attn, v + pos)
        res = res @ self.w2 + self.b2 + pre
        return res, attn


if __name__ == "__main__":
    key = jax.random.PRNGKey(0)
    B, N = 2, 128
    d_points, d_model, kn = 32, 64, 16

    kx_, kf_ = jax.random.split(key)
    xyz = jax.random.uniform(kx_, (B, N, 3), jnp.float32)
    features = jax.random.normal(kf_, (B, N, d_points), jnp.float32)

    block = TransformerBlock(d_points=d_points, d_model=d_model, k=kn)
    res, attn = block(xyz, features)
    jax.block_until_ready((res, attn))
    assert res.shape == (B, N, d_points)
    assert attn.shape == (B, N, kn, d_model)

    # correctness vs. plain-JAX f32 reference (kernels use bf16 MXU operands /
    # bf16 k,v,attn storage with f32 accumulation -> loosened tolerance)
    ref_res, ref_attn = block.reference(xyz, features)
    np.testing.assert_allclose(np.asarray(res), np.asarray(ref_res),
                               rtol=2e-2, atol=2e-2)
    np.testing.assert_allclose(np.asarray(attn), np.asarray(ref_attn),
                               rtol=2e-2, atol=2e-2)
    # softmax over the neighbour axis sums to ~1 per (point, channel); attn is
    # stored in bf16 so allow bf16-level rounding on the sum.
    np.testing.assert_allclose(np.asarray(jnp.sum(attn, axis=2)),
                               np.ones((B, N, d_model), np.float32),
                               rtol=0, atol=5e-3)

    print("KERNEL_OK")
</pallas_src>

<mosaic_0001>
module attributes {stable_mosaic.version = 11 : i64} {
  func.func @_proj_kernel(%arg0: i32, %arg1: memref<128x128xf32, #tpu.memory_space<vmem>>, %arg2: memref<128x384xbf16, #tpu.memory_space<vmem>>, %arg3: memref<1x384xf32, #tpu.memory_space<vmem>>, %arg4: memref<128x128xf32, #tpu.memory_space<vmem>>, %arg5: memref<128x128xbf16, #tpu.memory_space<vmem>>, %arg6: memref<128x128xbf16, #tpu.memory_space<vmem>>) attributes {dimension_semantics = [#tpu.dimension_semantics<parallel>], iteration_bounds = array<i64: 2>, scalar_prefetch = 0 : i64, scratch_operands = 0 : i64, tpu.core_type = #tpu.core_type<tc>, window_params = [{transform_indices = @transform_0, window_bounds = array<i64: 128, 128>}, {pipeline_mode = #tpu.pipeline_mode<synchronous>, transform_indices = @transform_1, window_bounds = array<i64: 128, 384>}, {pipeline_mode = #tpu.pipeline_mode<synchronous>, transform_indices = @transform_2, window_bounds = array<i64: 1, 384>}, {transform_indices = @transform_3, window_bounds = array<i64: 128, 128>}, {transform_indices = @transform_4, window_bounds = array<i64: 128, 128>}, {transform_indices = @transform_5, window_bounds = array<i64: 128, 128>}]} {
    %c0 = arith.constant 0 : index
    %c0_0 = arith.constant 0 : index
    %0 = vector.load %arg1[%c0, %c0_0] : memref<128x128xf32, #tpu.memory_space<vmem>>, vector<128x128xf32>
    %1 = arith.truncf %0 : vector<128x128xf32> to vector<128x128xbf16>
    %c0_1 = arith.constant 0 : index
    %c0_2 = arith.constant 0 : index
    %2 = vector.load %arg2[%c0_1, %c0_2] : memref<128x384xbf16, #tpu.memory_space<vmem>>, vector<128x384xbf16>
    %cst = arith.constant dense<0.000000e+00> : vector<128x384xf32>
    %3 = tpu.matmul %1, %2, %cst {dimension_numbers = #tpu.dot_dimension_numbers<[1], [0], [0], [1], [0, 0, 1, 1], [], []>} : vector<128x128xbf16>, vector<128x384xbf16>, vector<128x384xf32> -> vector<128x384xf32>
    %c0_3 = arith.constant 0 : index
    %c0_4 = arith.constant 0 : index
    %4 = vector.load %arg3[%c0_3, %c0_4] : memref<1x384xf32, #tpu.memory_space<vmem>>, vector<1x384xf32>
    %5 = vector.broadcast %4 : vector<1x384xf32> to vector<128x384xf32>
    %6 = arith.addf %3, %5 : vector<128x384xf32>
    %7 = vector.extract_strided_slice %6 {offsets = [0, 0], sizes = [128, 128], strides = [1, 1]} : vector<128x384xf32> to vector<128x128xf32>
    %c0_5 = arith.constant 0 : index
    %c0_6 = arith.constant 0 : index
    %8 = vector.load %arg4[%c0_5, %c0_6] : memref<128x128xf32, #tpu.memory_space<vmem>>, vector<128x128xf32>
    tpu.vector_store %arg4[%c0_5, %c0_6], %7 {strides = array<i32>} : memref<128x128xf32, #tpu.memory_space<vmem>>, vector<128x128xf32>,
    %9 = vector.extract_strided_slice %6 {offsets = [0, 128], sizes = [128, 128], strides = [1, 1]} : vector<128x384xf32> to vector<128x128xf32>
    %10 = arith.truncf %9 : vector<128x128xf32> to vector<128x128xbf16>
    %c0_7 = arith.constant 0 : index
    %c0_8 = arith.constant 0 : index
    %11 = vector.load %arg5[%c0_7, %c0_8] : memref<128x128xbf16, #tpu.memory_space<vmem>>, vector<128x128xbf16>
    tpu.vector_store %arg5[%c0_7, %c0_8], %10 {strides = array<i32>} : memref<128x128xbf16, #tpu.memory_space<vmem>>, vector<128x128xbf16>,
    %12 = vector.extract_strided_slice %6 {offsets = [0, 256], sizes = [128, 128], strides = [1, 1]} : vector<128x384xf32> to vector<128x128xf32>
    %13 = arith.truncf %12 : vector<128x128xf32> to vector<128x128xbf16>
    %c0_9 = arith.constant 0 : index
    %c0_10 = arith.constant 0 : index
    %14 = vector.load %arg6[%c0_9, %c0_10] : memref<128x128xbf16, #tpu.memory_space<vmem>>, vector<128x128xbf16>
    tpu.vector_store %arg6[%c0_9, %c0_10], %13 {strides = array<i32>} : memref<128x128xbf16, #tpu.memory_space<vmem>>, vector<128x128xbf16>,
    return
  }
  func.func @transform_0(%arg0: i32) -> (i32, i32) {
    %c0_i32 = arith.constant 0 : i32
    %c0_i32_0 = arith.constant 0 : i32
    return %arg0, %c0_i32 : i32, i32
  }
  func.func @transform_1(%arg0: i32) -> (i32, i32) {
    %c0_i32 = arith.constant 0 : i32
    %c0_i32_0 = arith.constant 0 : i32
    %c0_i32_1 = arith.constant 0 : i32
    return %c0_i32, %c0_i32_0 : i32, i32
  }
  func.func @transform_2(%arg0: i32) -> (i32, i32) {
    %c0_i32 = arith.constant 0 : i32
    %c0_i32_0 = arith.constant 0 : i32
    %c0_i32_1 = arith.constant 0 : i32
    return %c0_i32, %c0_i32_0 : i32, i32
  }
  func.func @transform_3(%arg0: i32) -> (i32, i32) {
    %c0_i32 = arith.constant 0 : i32
    %c0_i32_0 = arith.constant 0 : i32
    return %arg0, %c0_i32 : i32, i32
  }
  func.func @transform_4(%arg0: i32) -> (i32, i32) {
    %c0_i32 = arith.constant 0 : i32
    %c0_i32_0 = arith.constant 0 : i32
    return %arg0, %c0_i32 : i32, i32
  }
  func.func @transform_5(%arg0: i32) -> (i32, i32) {
    %c0_i32 = arith.constant 0 : i32
    %c0_i32_0 = arith.constant 0 : i32
    return %arg0, %c0_i32 : i32, i32
  }
}

</mosaic_0001>

<bundles_post_ra>
// kernel: tpu_custom_call.1
= control target key start
LH: loop header
LB: loop body
LE: loop exit
PB: predicated region body
PF: predicated region fallthrough
CT: control target
= control target key end

     0   :  { %s2082_s0 = inlined_call_operand.hbm [shape: f32[256,128], index: 0, kind: input, shape index: {}]   ;;  %s2083_s1 = inlined_call_operand.hbm [shape: bf16[128,384], index: 1, kind: input, shape index: {}]   ;;  %s2084_s2 = inlined_call_operand.vmem [shape: f32[1,384], index: 2, kind: input, shape index: {}]   ;;  %s2085_s3 = inlined_call_operand.hbm [shape: f32[256,128], index: 3, kind: output, shape index: {0}]   ;;  %s2086_s4 = inlined_call_operand.hbm [shape: bf16[256,128], index: 4, kind: output, shape index: {1}]   ;;  %s2087_s5 = inlined_call_operand.hbm [shape: bf16[256,128], index: 5, kind: output, shape index: {2}]  }
   0x1   :  { %2093 = sst [smem:[#allocation15_spill]] %s2082_s0 }
   0x2   :  { %2094 = sst [smem:[#allocation16_spill]] %s2083_s1 }
   0x3   :  { %11 = vsyncpa [#allocation3], 0 }
   0x4   :  { %13 = vsyncpa [#allocation3 + $0x1], 0 }
   0x5   :  { %14 = vsyncpa [#allocation6], 0 }
   0x6   :  { %15 = vsyncpa [#allocation4], 0 }
   0x7   :  { %17 = vsyncpa [#allocation4 + $0x1], 0 }
   0x8   :  { %18 = vsyncpa [#allocation9], 0 }
   0x9   :  { %20 = vsyncpa [#allocation9 + $0x1], 0  ;;  %s1668_s18 = smov 0   ;;  %s1670_s19 = smov 0  }
   0xa   :  { %s1672_s20 = smov 0   ;;  %s1674_s21 = smov 0  }
   0xb LB: > { %s1689_s22 = sadd.s32 4294967295, %s1622_s21   ;;  %s2091_s23 = sadd.s32 4294967294, %s1622_s21   ;;  %s1622_s21 = sphi %s1674_s21, %s2117_s21   ;;  %s1618_s20 = sphi %s1672_s20, %s2116_s20   ;;  %s1614_s19 = sphi %s1670_s19, %s2115_s19   ;;  %s1610_s18 = sphi %s1668_s18, %s2114_s18  }
   0xc   : > { %p46_p0 = scmp.ne.s32.totalorder %s1614_s19, %s1610_s18  ;;  %p2088_p1 = scmp.eq.s32.totalorder %s1689_s22, 0 }
   0xd   : > { %p118_p3 = scmp.eq.s32.totalorder %s2091_s23, 1  ;;  %p1069_p5 = scmp.ge.s32.totalorder %s1622_s21, 1 }
   0xe   : > { %p1700_p4 = por %p2088_p1, %p46_p0  ;;  %p177_p7 = scmp.lt.s32.totalorder %s1622_s21, 3 }
   0xf   : > { %p1705_p6 = por %p118_p3, %p46_p0  ;;  %s1624_s27 = smov [#allocation5]  }
  0x10   : > { %s2095_s24 = scalar_select %p1700_p4, 1, 0 }
  0x11   : > { %s2096_s25 = scalar_select %p1705_p6, 1, 0 }
  0x12   : > { %p1710_p8 = pnand %p1069_p5, %p177_p7  ;;  %s189_s28 = sshll.u32 %s1624_s27, 4  ;;  %s1714_s28 = int_to_ptr.vmem [resolvable:$true] %s189_s28 }
  0x13   : > { %s1726_s30 = sadd.s32 1, %s1622_s21   ;;  %s33_s6 = sadd.s32 1, %s1618_s20 }
  0x14   : > { %s2097_s26 = scalar_select %p1710_p8, 1, 0 }
  0x15   : > { %p1338_p9 = pneg %p1710_p8  ;;  %s30_s7 = ssub.s32 %s1622_s21, %s1726_s30 }
  0x16   : > { %s2099_s1 = sld [smem:[#allocation16_spill]] }
  0x17   : > { %p1721_p11 = pnand %p1338_p9, %p2088_p1 }
  0x19   : > { %p1436_p13 = pneg %p1721_p11 }
  0x1c   : > { %s1434_s10 = scalar_lea.hbm %s2099_s1, 3072 }
  0x1d   : > { %p1435_p12 = scmp.ne.s32.totalorder %s2099_s1, %s1434_s10  ;;  %p1441_p5 = scmp.lt.u32.totalorder %s1434_s10, %s2099_s1 }
  0x1f   : > { %p1437_p0 = pnand %p1436_p13, %p1435_p12 }
  0x21   : > { %p1438_p3 = pneg %p1437_p0 }
  0x23   : > { %p1443_p7 = pnand %p1441_p5, %p1438_p3 }
  0x25   : > { %1446 = shalt.err (!%p1443_p7)
}
  0x26   : > { %s1447_s15 = scalar_lea.vmem %s1714_s28, 3072  ;;  %p1455_p2 = scmp.lt.s32.totalorder %s1714_s28, %s1714_s28 }
  0x27   : > { %p1448_p9 = scmp.ne.s32.totalorder %s1714_s28, %s1447_s15  ;;  %p1456_p6 = scmp.lt.s32.totalorder %s1447_s15, %s1447_s15 }
  0x29   : > { %p1450_p10 = pnand %p1448_p9, %p1436_p13  ;;  %p1457_p4 = por %p1456_p6, %p1455_p2 }
  0x2b   : > { %p1451_p1 = pneg %p1450_p10 }
  0x2d   : > { %p1458_p8 = pnand %p1457_p4, %p1451_p1 }
  0x2f   : > { %1461 = shalt.err (!%p1458_p8)
}
  0x30   : > { %s1625_s16 = smov 192   ;;  %s1626_s17 = smov 12  }
  0x31   : > { %1341 = dma.hbm_to_vmem [thread:$0]  (!%p1721_p11), %s2099_s1, 3072, %s1714_s28, [#allocation6], %s1625_s16, %s1625_s16, %s1626_s17  }
  0x32   : > { %p31_p2 = scmp.eq.s32.totalorder %s30_s7, 0  ;;  %p40_p1 = scmp.ne.s32.totalorder %s1618_s20, %s1614_s19 }
  0x33   : > { %p41_p4 = scmp.eq.s32.totalorder %s1622_s21, 0  ;;  %p1357_p6 = scmp.lt.s32.totalorder %s1622_s21, 2 }
  0x34   : > { %s1757_s9 = scalar_select %p31_p2, %s1618_s20, %s33_s6  }
  0x35   : > { %p42_p8 = por %p41_p4, %p40_p1  ;;  %p2100_p10 = scmp.eq.s32.totalorder %s1689_s22, 1 }
  0x36   : > { %s206_s11 = sand.u32 1, %s1618_s20   ;;  %s1148_s12 = sshll.u32 %s1622_s21, 11 }
  0x37   : > { %p1761_p12 = por %p2100_p10, %p40_p1  ;;  %s1072_s13 = sshll.u32 %s206_s11, 7 }
  0x38   : > { %s2102_s0 = sld [smem:[#allocation15_spill]]  ;;  %s210_s28 = scalar_lea.vmem [#allocation2], %s1072_s13 }
  0x39   : > { %s217_s6 = sshll.u32 %s210_s28, 4  ;;  %p1772_p11 = pnand %p1357_p6, %p42_p8  ;;  %s1776_s6 = int_to_ptr.vmem [resolvable:$true] %s217_s6 }
  0x3a   : > { %s1778_s16 = scalar_lea.sflag [#allocation3], %s206_s11 }
  0x3b   : > { %p1464_p0 = pneg %p1772_p11 }
  0x3e   : > { %s1770_s15 = scalar_lea.hbm %s2102_s0, %s1148_s12  ;;  %s1467_s12 = scalar_lea.hbm %s2102_s0, 4096 }
  0x3f   : > { %s1462_s17 = scalar_lea.hbm %s1770_s15, 2048  ;;  %p1468_p7 = scmp.lt.u32.totalorder %s1770_s15, %s2102_s0 }
  0x40   : > { %p1463_p13 = scmp.ne.s32.totalorder %s1770_s15, %s1462_s17  ;;  %p1469_p9 = scmp.lt.u32.totalorder %s1467_s12, %s1462_s17 }
  0x41   : > { %p1471_p1 = scmp.lt.u32.totalorder %s1462_s17, %s1770_s15 }
  0x42   : > { %p1465_p3 = pnand %p1464_p0, %p1463_p13  ;;  %p1470_p2 = por %p1469_p9, %p1468_p7 }
  0x44   : > { %p1466_p5 = pneg %p1465_p3  ;;  %p1472_p4 = por %p1471_p1, %p1470_p2 }
  0x46   : > { %p1473_p6 = pnand %p1472_p4, %p1466_p5 }
  0x48   : > { %1476 = shalt.err (!%p1473_p6)
}
  0x49   : > { %s1477_s11 = scalar_lea.vmem %s1776_s6, 2048  ;;  %s1627_s14 = smov [#allocation2]  }
  0x4a   : > { %p1478_p8 = scmp.ne.s32.totalorder %s1776_s6, %s1477_s11  ;;  %s1482_s28 = sshll.u32 %s1627_s14, 4  ;;  %s1483_s28 = int_to_ptr.vmem [resolvable:$false] %s1482_s28 }
  0x4b   : > { %s1484_s27 = scalar_lea.vmem %s1483_s28, 4096  ;;  %p1485_p3 = scmp.lt.s32.totalorder %s1776_s6, %s1483_s28 }
  0x4c   : > { %p1480_p10 = pnand %p1478_p8, %p1464_p0  ;;  %p1486_p7 = scmp.lt.s32.totalorder %s1484_s27, %s1477_s11 }
  0x4e   : > { %p1481_p13 = pneg %p1480_p10  ;;  %p1487_p9 = por %p1486_p7, %p1485_p3 }
  0x50   : > { %p1488_p2 = pnand %p1487_p9, %p1481_p13 }
  0x52   : > { %1491 = shalt.err (!%p1488_p2)
}
  0x53   : > { %s1628_s17 = smov 128   ;;  %s1629_s8 = smov 8  }
  0x54   : > { %1345 = dma.hbm_to_vmem [thread:$0]  (!%p1772_p11), %s1770_s15, 2048, %s1776_s6, %s1778_s16, %s1628_s17, %s1628_s17, %s1629_s8  }
  0x55   : > { %p2104_p0 = scmp.ne.s32.totalorder %s2097_s26, 0 }
  0x56   : > { %s1809_s12 = sand.u32 (!%p2104_p0), 1, %s1614_s19   ;;  %p2105_p5 = scmp.ne.s32.totalorder (!%p2104_p0), %s2095_s24, 0 }
  0x57   : > { %229 = sbr.rel (%p2104_p0) target bundleno = 467 (0x1d3), region = 32  ;;  %s1076_s13 = sshll.u32 (!%p2104_p0), %s1809_s12, 7 }
  0x58   : > { %s232_s29 = scalar_lea.sflag (!%p2104_p0), [#allocation3], %s1809_s12  ;;  %s1815_s11 = scalar_lea.vmem (!%p2104_p0), [#allocation2], %s1076_s13 }
  0x5e   : > { %1593 = dma.done.wait (%p2105_p5), %s232_s29, 2048  }
  0x5f   : > { %1595 = vsyncadd (%p2105_p5), %s232_s29, 4294965248  ;;  %p2106_p11 = scmp.eq.s32.totalorder %s1689_s22, 0 }
  0x61   : > { %1597 = dma.done.wait (%p2106_p11), [#allocation6], 3072   ;;  %p2107_p1 = pmov %p2106_p11 }
  0x62   : > { %v1630_v0 = vmov 0   ;;  %v1402_v1 = vld [vmem:[#allocation5 + $0x4] ss:$12 sps:$4 sm:$0xff]   ;;  %v1404_v2 = vld [vmem:[#allocation5] ss:$12 sps:$4 sm:$0xff]   ;;  %v284_v28 = vld [vmem:[%s1815_s11 + $0x18] sm:$0xff]  ;;  %v339_v49 = vlaneseq }
  0x63   : > { %1599 = vsyncadd (%p2107_p1), [#allocation6], 4294964224  ;;  %514 = vmatprep.mubr.bf16.mxu0 %v1630_v0  ;;  %482 = vmatprep.subr.bf16.mxu0 %v1402_v1  ;;  %v1405_v3 = vld [vmem:[#allocation5 + $0x1c] ss:$12 sps:$4 sm:$0xff]   ;;  %v1407_v4 = vld [vmem:[#allocation5 + $0x18] ss:$12 sps:$4 sm:$0xff]  }
  0x64   : > { %483 = vmatpush1.bf16.msra.mxu0 %v1404_v2  ;;  %v1408_v5 = vld [vmem:[#allocation5 + $0x34] ss:$12 sps:$4 sm:$0xff]   ;;  %v1410_v6 = vld [vmem:[#allocation5 + $0x30] ss:$12 sps:$4 sm:$0xff]   ;;  %v1411_v7 = vld [vmem:[#allocation5 + $0x4c] ss:$12 sps:$4 sm:$0xff]  }
  0x65   : > { %484 = vmatprep.subr.bf16.mxu0 %v1405_v3  ;;  %v1413_v8 = vld [vmem:[#allocation5 + $0x48] ss:$12 sps:$4 sm:$0xff]   ;;  %v1414_v9 = vld [vmem:[#allocation5 + $0x64] ss:$12 sps:$4 sm:$0xff]   ;;  %v1427_v13 = vld [vmem:[#allocation5 + $0x20] ss:$12 sps:$4 sm:$0xff]  }
  0x66   : > { %v1426_v10 = vld [vmem:[#allocation5 + $0x8] ss:$12 sps:$4 sm:$0xff]   ;;  %v281_v11 = vld [vmem:[%s1815_s11] sm:$0xff]  ;;  %v1429_v19 = vld [vmem:[#allocation5 + $0x50] ss:$12 sps:$4 sm:$0xff]   ;;  %v340_v50 = vshrl.u32 %v339_v49, 7 }
  0x67   : > { %v282_v12 = vld [vmem:[%s1815_s11 + $0x8] sm:$0xff]  ;;  %1294 = vmatprep.subr.bf16.mxu1 %v1426_v10  ;;  %v1428_v16 = vld [vmem:[#allocation5 + $0x38] ss:$12 sps:$4 sm:$0xff]   ;;  %v1420_v20 = vld [vmem:[#allocation5 + $0x94] ss:$12 sps:$4 sm:$0xff]   ;;  %s1079_s15 = sshll.u32 %s1809_s12, 6 }
  0x68   : > { %485 = vmatpush1.bf16.msra.mxu0 %v1407_v4  ;;  %v1416_v14 = vld [vmem:[#allocation5 + $0x60] ss:$12 sps:$4 sm:$0xff]   ;;  %1295 = vmatpush3.bf16.msra.mxu1 %v1426_v10  ;;  %v297_v15 = vpack.c.bf16 %v282_v12, %v281_v11  ;;  %v1417_v17 = vld [vmem:[#allocation5 + $0x7c] ss:$12 sps:$4 sm:$0xff]   ;;  %v1419_v18 = vld [vmem:[#allocation5 + $0x78] ss:$12 sps:$4 sm:$0xff]  }
  0x69   : > { %486 = vmatprep.subr.bf16.mxu0 %v1408_v5  ;;  %1296 = vmatprep.subr.bf16.mxu1 %v1427_v13  ;;  %v1422_v21 = vld [vmem:[#allocation5 + $0x90] ss:$12 sps:$4 sm:$0xff]   ;;  %v1430_v22 = vld [vmem:[#allocation5 + $0x68] ss:$12 sps:$4 sm:$0xff]   ;;  %v1423_v23 = vld [vmem:[#allocation5 + $0xac] ss:$12 sps:$4 sm:$0xff]  }
  0x6a   : > { %1310 = vmatprep.mubr.bf16.mxu1 %v297_v15  ;;  %v1425_v24 = vld [vmem:[#allocation5 + $0xa8] ss:$12 sps:$4 sm:$0xff]   ;;  %v1431_v25 = vld [vmem:[#allocation5 + $0x80] ss:$12 sps:$4 sm:$0xff]   ;;  %v1432_v26 = vld [vmem:[#allocation5 + $0x98] ss:$12 sps:$4 sm:$0xff]  }
  0x6b   : > { %v283_v27 = vld [vmem:[%s1815_s11 + $0x10] sm:$0xff]  ;;  %v285_v31 = vld [vmem:[%s1815_s11 + $0x20] sm:$0xff]  ;;  %v286_v32 = vld [vmem:[%s1815_s11 + $0x28] sm:$0xff]  ;;  %v341_v51 = vsub.s32 0, %v340_v50  ;;  %v345_v53 = vsub.s32 1, %v340_v50  ;;  %s1860_s6 = scalar_lea.vmem [#allocation7], %s1076_s13 }
  0x6c   : > { %487 = vmatpush1.bf16.msra.mxu0 %v1410_v6  ;;  %1297 = vmatpush3.bf16.msra.mxu1 %v1427_v13  ;;  %v1433_v29 = vld [vmem:[#allocation5 + $0xb0] ss:$12 sps:$4 sm:$0xff]   ;;  %v298_v30 = vpack.c.bf16 %v284_v28, %v283_v27  ;;  %v299_v33 = vpack.c.bf16 %v286_v32, %v285_v31  ;;  %v289_v36 = vld [vmem:[%s1815_s11 + $0x40] sm:$0xff]  ;;  %v290_v37 = vld [vmem:[%s1815_s11 + $0x48] sm:$0xff]  ;;  %s1869_s7 = scalar_lea.vmem [#allocation8], %s1079_s15  ;;  %s1888_s16 = scalar_lea.vmem [#allocation10], %s1079_s15 }
  0x6d   : > { %488 = vmatprep.subr.bf16.mxu0 %v1411_v7  ;;  %1298 = vmatprep.subr.bf16.mxu1 %v1428_v16  ;;  %v287_v34 = vld [vmem:[%s1815_s11 + $0x30] sm:$0xff]  ;;  %v288_v35 = vld [vmem:[%s1815_s11 + $0x38] sm:$0xff]  ;;  %v301_v39 = vpack.c.bf16 %v290_v37, %v289_v36  ;;  %v293_v42 = vld [vmem:[%s1815_s11 + $0x60] sm:$0xff]  ;;  %s908_s14 = sshll.u32 %s1869_s7, 4  ;;  %s1181_s28 = sshll.u32 %s1689_s22, 11  ;;  %s1944_s14 = int_to_ptr.vmem [resolvable:$true] %s908_s14 }
  0x6e   : > { %v300_v38 = vpack.c.bf16 %v288_v35, %v287_v34  ;;  %v291_v40 = vld [vmem:[%s1815_s11 + $0x50] sm:$0xff]  ;;  %v292_v41 = vld [vmem:[%s1815_s11 + $0x58] sm:$0xff]  ;;  %v294_v43 = vld [vmem:[%s1815_s11 + $0x68] sm:$0xff]  ;;  %s892_s27 = sshll.u32 %s1860_s6, 4  ;;  %s2092_s13 = sshll.u32 %s1689_s22, 10  ;;  %s1958_s27 = int_to_ptr.vmem [resolvable:$true] %s892_s27 }
  0x6f   : > { %v302_v44 = vpack.c.bf16 %v292_v41, %v291_v40  ;;  %v303_v45 = vpack.c.bf16 %v294_v43, %v293_v42  ;;  %v295_v46 = vld [vmem:[%s1815_s11 + $0x70] sm:$0xff]  ;;  %v296_v47 = vld [vmem:[%s1815_s11 + $0x78] sm:$0xff]  ;;  %v337_v52 = vld [vmem:[%s2084_s2] sm:$0x7]  ;;  %s1956_s24 = scalar_lea.hbm %s2085_s3, %s1181_s28  ;;  %s1969_s29 = scalar_lea.hbm %s2086_s4, %s2092_s13 }
  0x70   : > { %489 = vmatpush1.bf16.msra.mxu0 %v1413_v8  ;;  %1299 = vmatpush3.bf16.msra.mxu1 %v1428_v16  ;;  %v304_v48 = vpack.c.bf16 %v296_v47, %v295_v46  ;;  %v1852_v54 = vrot.slane %v337_v52, %v341_v51  ;;  %v1854_v56 = vrot.slane %v337_v52, %v345_v53  ;;  %s869_s28 = scalar_lea.sflag [#allocation4], %s1809_s12  ;;  %s1492_s11 = scalar_lea.vmem %s1958_s27, 2048 }
  0x71   : > { %490 = vmatprep.subr.bf16.mxu0 %v1414_v9  ;;  %1300 = vmatprep.subr.bf16.mxu1 %v1429_v19  ;;  %p1493_p4 = scmp.ne.s32.totalorder %s1958_s27, %s1492_s11  ;;  %s1631_s23 = smov [#allocation7]  }
  0x72   : > { %s1496_s8 = sshll.u32 %s1631_s23, 4  ;;  %s1497_s8 = int_to_ptr.vmem [resolvable:$false] %s1496_s8 }
  0x73   : > { %p1494_p6 = pnand %p1493_p4, %p1761_p12  ;;  %s1498_s17 = scalar_lea.vmem %s1497_s8, 4096 }
  0x74   : > { %491 = vmatpush1.bf16.msra.mxu0 %v1416_v14  ;;  %1301 = vmatpush3.bf16.msra.mxu1 %v1429_v19  ;;  %p1499_p10 = scmp.lt.s32.totalorder %s1958_s27, %s1497_s8  ;;  %p1500_p13 = scmp.lt.s32.totalorder %s1498_s17, %s1492_s11 }
  0x75   : > { %492 = vmatprep.subr.bf16.mxu0 %v1417_v17  ;;  %1302 = vmatprep.subr.bf16.mxu1 %v1430_v22  ;;  %p1495_p8 = pneg %p1494_p6 }
  0x76   : > { %p1501_p3 = por %p1500_p13, %p1499_p10 }
  0x78   : > { %493 = vmatpush1.bf16.msra.mxu0 %v1419_v18  ;;  %1303 = vmatpush3.bf16.msra.mxu1 %v1430_v22  ;;  %p1502_p7 = pnand %p1501_p3, %p1495_p8 }
  0x79   : > { %494 = vmatprep.subr.bf16.mxu0 %v1420_v20  ;;  %1304 = vmatprep.subr.bf16.mxu1 %v1431_v25 }
  0x7c   : > { %495 = vmatpush1.bf16.msra.mxu0 %v1422_v21  ;;  %1305 = vmatpush3.bf16.msra.mxu1 %v1431_v25 }
  0x7d   : > { %496 = vmatprep.subr.bf16.mxu0 %v1423_v23  ;;  %1306 = vmatprep.subr.bf16.mxu1 %v1432_v26 }
  0x80   : > { %497 = vmatpush1.bf16.msra.mxu0 %v1425_v24  ;;  %1307 = vmatpush3.bf16.msra.mxu1 %v1432_v26 }
  0x81   : > { %1308 = vmatprep.subr.bf16.mxu1 %v1433_v29 }
  0x83   : > { %515 = vmatmul.mubr.bf16.vlgmr.msra.gmra.mrb[0].mxu0 %v297_v15 }
  0x84   : > { %524 = vmatprep.mubr.bf16.mxu0 %v1630_v0  ;;  %1309 = vmatpush3.bf16.msra.mxu1 %v1433_v29 }
  0x87   : > { %1311 = vmatmul.mubr.bf16.vlgmr.msra.gmra.mrb[0].mxu1 %v298_v30 }
  0x88   : > { %1314 = vmatprep.mubr.bf16.mxu1 %v299_v33 }
  0x8b   : > { %525 = vmatmul.mubr.bf16.gmra.mrb[4].mxu0 %v298_v30 }
  0x8c   : > { %534 = vmatprep.mubr.bf16.mxu0 %v1630_v0 }
  0x8f   : > { %1315 = vmatmul.mubr.bf16.gmra.mrb[4].mxu1 %v300_v38 }
  0x90   : > { %1318 = vmatprep.mubr.bf16.mxu1 %v301_v39 }
  0x93   : > { %535 = vmatmul.mubr.bf16.gmra.mrb[8].mxu0 %v299_v33 }
  0x94   : > { %544 = vmatprep.mubr.bf16.mxu0 %v1630_v0 }
  0x97   : > { %1319 = vmatmul.mubr.bf16.gmra.mrb[8].mxu1 %v302_v44 }
  0x98   : > { %1322 = vmatprep.mubr.bf16.mxu1 %v303_v45 }
  0x9b   : > { %545 = vmatmul.mubr.bf16.gmra.mrb[12].mxu0 %v300_v38 }
  0x9c   : > { %554 = vmatprep.mubr.bf16.mxu0 %v1630_v0 }
  0x9f   : > { %1323 = vmatmul.mubr.bf16.gmra.mrb[12].mxu1 %v304_v48 }
  0xa3   : > { %555 = vmatmul.mubr.bf16.gmra.mrb[16].mxu0 %v301_v39 }
  0xa4   : > { %564 = vmatprep.mubr.bf16.mxu0 %v1630_v0 }
  0xab   : > { %565 = vmatmul.mubr.bf16.gmra.mrb[20].mxu0 %v302_v44 }
  0xac   : > { %574 = vmatprep.mubr.bf16.mxu0 %v1630_v0 }
  0xb3   : > { %575 = vmatmul.mubr.bf16.gmra.mrb[24].mxu0 %v303_v45 }
  0xb4   : > { %584 = vmatprep.mubr.bf16.mxu0 %v1630_v0  ;;  %v349_v0 = vsub.s32 2, %v340_v50 }
  0xb6   : > { %v1872_v3 = vrot.slane %v337_v52, %v349_v0 }
  0xbb   : > { %585 = vmatmul.mubr.bf16.gmra.mrb[28].mxu0 %v304_v48 }
 0x156   : > { %v516_v55 = vpop.f32.mrb[0].mxu0 }
 0x157   : > { %v517_v57 = vadd.f32 %v516_v55, %v1852_v54  ;;  %v518_v58 = vpop.f32.mrb[1].mxu0 }
 0x158   : > { %v520_v59 = vpop.f32.mrb[2].mxu0  ;;  %v519_v62 = vadd.f32 %v518_v58, %v1854_v56 }
 0x159   : > { %692 = vst [vmem:[%s1860_s6] sm:$0xff] %v517_v57  ;;  %v521_v60 = vadd.f32 %v520_v59, %v1852_v54  ;;  %v522_v61 = vpop.f32.mrb[3].mxu0 }
 0x15a   : > { %v523_v63 = vadd.f32 %v522_v61, %v1854_v56  ;;  %v1312_v9 = vpop.f32.mrb[0].mxu1 }
 0x15b   : > { %693 = vst [vmem:[%s1860_s6 + $0x8] sm:$0xff] %v521_v60  ;;  %v638_v12 = vadd.f32 %v1312_v9, %v1872_v3  ;;  %v629_v13 = vpop.f32.mrb[1].mxu1 }
 0x15c   : > { %v1187_v1 = vpack.c.bf16 %v523_v63, %v519_v62  ;;  %v630_v14 = vadd.f32 %v629_v13, %v1872_v3  ;;  %v1313_v15 = vpop.f32.mrb[2].mxu1 }
 0x15d   : > { %v641_v17 = vadd.f32 %v1313_v15, %v1872_v3  ;;  %v632_v18 = vpop.f32.mrb[3].mxu1 }
 0x15e   : > { %1188 = vst [vmem:[%s1869_s7] sm:$0xff] %v1187_v1   ;;  %v526_v2 = vpop.f32.mrb[4].mxu0  ;;  %v633_v19 = vadd.f32 %v632_v18, %v1872_v3 }
 0x15f   : > { %v527_v4 = vadd.f32 %v526_v2, %v1852_v54  ;;  %v528_v5 = vpop.f32.mrb[5].mxu0  ;;  %v1232_v21 = vpack.c.bf16 %v641_v17, %v638_v12 }
 0x160   : > { %v530_v6 = vpop.f32.mrb[6].mxu0  ;;  %v529_v10 = vadd.f32 %v528_v5, %v1854_v56  ;;  %v1227_v24 = vpack.c.bf16 %v633_v19, %v630_v14 }
 0x161   : > { %694 = vst [vmem:[%s1860_s6 + $0x10] sm:$0xff] %v527_v4  ;;  %v531_v7 = vadd.f32 %v530_v6, %v1852_v54  ;;  %v532_v8 = vpop.f32.mrb[7].mxu0  ;;  %1271 = vst [vmem:[%s1888_s16 + $0x8] sm:$0xff] %v1232_v21  }
 0x162   : > { %v533_v11 = vadd.f32 %v532_v8, %v1854_v56  ;;  %1228 = vst [vmem:[%s1888_s16] sm:$0xff] %v1227_v24   ;;  %v1316_v28 = vpop.f32.mrb[4].mxu1 }
 0x163   : > { %695 = vst [vmem:[%s1860_s6 + $0x18] sm:$0xff] %v531_v7  ;;  %v654_v31 = vadd.f32 %v1316_v28, %v1872_v3  ;;  %v645_v32 = vpop.f32.mrb[5].mxu1 }
 0x164   : > { %v1192_v16 = vpack.c.bf16 %v533_v11, %v529_v10  ;;  %v646_v33 = vadd.f32 %v645_v32, %v1872_v3  ;;  %v1317_v34 = vpop.f32.mrb[6].mxu1 }
 0x165   : > { %v657_v36 = vadd.f32 %v1317_v34, %v1872_v3  ;;  %v648_v37 = vpop.f32.mrb[7].mxu1 }
 0x166   : > { %1264 = vst [vmem:[%s1869_s7 + $0x8] sm:$0xff] %v1192_v16   ;;  %v536_v20 = vpop.f32.mrb[8].mxu0  ;;  %v649_v38 = vadd.f32 %v648_v37, %v1872_v3 }
 0x167   : > { %v537_v22 = vadd.f32 %v536_v20, %v1852_v54  ;;  %v538_v23 = vpop.f32.mrb[9].mxu0  ;;  %v1242_v40 = vpack.c.bf16 %v657_v36, %v654_v31 }
 0x168   : > { %v540_v25 = vpop.f32.mrb[10].mxu0  ;;  %v539_v29 = vadd.f32 %v538_v23, %v1854_v56  ;;  %v1237_v43 = vpack.c.bf16 %v649_v38, %v646_v33 }
 0x169   : > { %696 = vst [vmem:[%s1860_s6 + $0x20] sm:$0xff] %v537_v22  ;;  %v541_v26 = vadd.f32 %v540_v25, %v1852_v54  ;;  %v542_v27 = vpop.f32.mrb[11].mxu0  ;;  %1273 = vst [vmem:[%s1888_s16 + $0x18] sm:$0xff] %v1242_v40  }
 0x16a   : > { %v543_v30 = vadd.f32 %v542_v27, %v1854_v56  ;;  %1272 = vst [vmem:[%s1888_s16 + $0x10] sm:$0xff] %v1237_v43   ;;  %v1320_v47 = vpop.f32.mrb[8].mxu1 }
 0x16b   : > { %697 = vst [vmem:[%s1860_s6 + $0x28] sm:$0xff] %v541_v26  ;;  %v670_v50 = vadd.f32 %v1320_v47, %v1872_v3  ;;  %v661_v51 = vpop.f32.mrb[9].mxu1 }
 0x16c   : > { %v1197_v35 = vpack.c.bf16 %v543_v30, %v539_v29  ;;  %v662_v52 = vadd.f32 %v661_v51, %v1872_v3  ;;  %v1321_v53 = vpop.f32.mrb[10].mxu1 }
 0x16d   : > { %v673_v57 = vadd.f32 %v1321_v53, %v1872_v3  ;;  %v664_v58 = vpop.f32.mrb[11].mxu1 }
 0x16e   : > { %1265 = vst [vmem:[%s1869_s7 + $0x10] sm:$0xff] %v1197_v35   ;;  %v546_v39 = vpop.f32.mrb[12].mxu0  ;;  %v665_v59 = vadd.f32 %v664_v58, %v1872_v3 }
 0x16f   : > { %v547_v41 = vadd.f32 %v546_v39, %v1852_v54  ;;  %v548_v42 = vpop.f32.mrb[13].mxu0  ;;  %v1252_v61 = vpack.c.bf16 %v673_v57, %v670_v50 }
 0x170   : > { %v550_v44 = vpop.f32.mrb[14].mxu0  ;;  %v549_v48 = vadd.f32 %v548_v42, %v1854_v56  ;;  %v1247_v0 = vpack.c.bf16 %v665_v59, %v662_v52 }
 0x171   : > { %698 = vst [vmem:[%s1860_s6 + $0x30] sm:$0xff] %v547_v41  ;;  %v551_v45 = vadd.f32 %v550_v44, %v1852_v54  ;;  %v552_v46 = vpop.f32.mrb[15].mxu0  ;;  %1275 = vst [vmem:[%s1888_s16 + $0x28] sm:$0xff] %v1252_v61  }
 0x172   : > { %v553_v49 = vadd.f32 %v552_v46, %v1854_v56  ;;  %1274 = vst [vmem:[%s1888_s16 + $0x20] sm:$0xff] %v1247_v0   ;;  %v1324_v5 = vpop.f32.mrb[12].mxu1 }
 0x173   : > { %699 = vst [vmem:[%s1860_s6 + $0x38] sm:$0xff] %v551_v45  ;;  %v686_v8 = vadd.f32 %v1324_v5, %v1872_v3  ;;  %v677_v9 = vpop.f32.mrb[13].mxu1 }
 0x174   : > { %v1202_v55 = vpack.c.bf16 %v553_v49, %v549_v48  ;;  %v678_v10 = vadd.f32 %v677_v9, %v1872_v3  ;;  %v1325_v11 = vpop.f32.mrb[14].mxu1 }
 0x175   : > { %v689_v13 = vadd.f32 %v1325_v11, %v1872_v3  ;;  %v680_v14 = vpop.f32.mrb[15].mxu1 }
 0x176   : > { %1266 = vst [vmem:[%s1869_s7 + $0x18] sm:$0xff] %v1202_v55   ;;  %v556_v60 = vpop.f32.mrb[16].mxu0  ;;  %v681_v15 = vadd.f32 %v680_v14, %v1872_v3 }
 0x177   : > { %v557_v62 = vadd.f32 %v556_v60, %v1852_v54  ;;  %v558_v63 = vpop.f32.mrb[17].mxu0  ;;  %v1262_v17 = vpack.c.bf16 %v689_v13, %v686_v8 }
 0x178   : > { %v560_v1 = vpop.f32.mrb[18].mxu0  ;;  %v559_v6 = vadd.f32 %v558_v63, %v1854_v56  ;;  %v1257_v20 = vpack.c.bf16 %v681_v15, %v678_v10 }
 0x179   : > { %700 = vst [vmem:[%s1860_s6 + $0x40] sm:$0xff] %v557_v62  ;;  %v561_v2 = vadd.f32 %v560_v1, %v1852_v54  ;;  %v562_v4 = vpop.f32.mrb[19].mxu0  ;;  %1277 = vst [vmem:[%s1888_s16 + $0x38] sm:$0xff] %v1262_v17  }
 0x17a   : > { %v563_v7 = vadd.f32 %v562_v4, %v1854_v56  ;;  %1276 = vst [vmem:[%s1888_s16 + $0x30] sm:$0xff] %v1257_v20  }
 0x17b   : > { %701 = vst [vmem:[%s1860_s6 + $0x48] sm:$0xff] %v561_v2 }
 0x17c   : > { %v1207_v12 = vpack.c.bf16 %v563_v7, %v559_v6 }
 0x17e   : > { %1267 = vst [vmem:[%s1869_s7 + $0x20] sm:$0xff] %v1207_v12   ;;  %v566_v16 = vpop.f32.mrb[20].mxu0 }
 0x17f   : > { %v567_v18 = vadd.f32 %v566_v16, %v1852_v54  ;;  %v568_v19 = vpop.f32.mrb[21].mxu0 }
 0x180   : > { %v570_v21 = vpop.f32.mrb[22].mxu0  ;;  %v569_v3 = vadd.f32 %v568_v19, %v1854_v56 }
 0x181   : > { %702 = vst [vmem:[%s1860_s6 + $0x50] sm:$0xff] %v567_v18  ;;  %v571_v22 = vadd.f32 %v570_v21, %v1852_v54  ;;  %v572_v23 = vpop.f32.mrb[23].mxu0 }
 0x182   : > { %v573_v24 = vadd.f32 %v572_v23, %v1854_v56 }
 0x183   : > { %703 = vst [vmem:[%s1860_s6 + $0x58] sm:$0xff] %v571_v22 }
 0x184   : > { %v1212_v25 = vpack.c.bf16 %v573_v24, %v569_v3 }
 0x186   : > { %1268 = vst [vmem:[%s1869_s7 + $0x28] sm:$0xff] %v1212_v25   ;;  %v576_v26 = vpop.f32.mrb[24].mxu0 }
 0x187   : > { %v577_v27 = vadd.f32 %v576_v26, %v1852_v54  ;;  %v578_v28 = vpop.f32.mrb[25].mxu0 }
 0x188   : > { %v580_v29 = vpop.f32.mrb[26].mxu0  ;;  %v579_v32 = vadd.f32 %v578_v28, %v1854_v56 }
 0x189   : > { %704 = vst [vmem:[%s1860_s6 + $0x60] sm:$0xff] %v577_v27  ;;  %v581_v30 = vadd.f32 %v580_v29, %v1852_v54  ;;  %v582_v31 = vpop.f32.mrb[27].mxu0 }
 0x18a   : > { %v583_v33 = vadd.f32 %v582_v31, %v1854_v56 }
 0x18b   : > { %705 = vst [vmem:[%s1860_s6 + $0x68] sm:$0xff] %v581_v30 }
 0x18c   : > { %v1217_v34 = vpack.c.bf16 %v583_v33, %v579_v32 }
 0x18e   : > { %1269 = vst [vmem:[%s1869_s7 + $0x30] sm:$0xff] %v1217_v34   ;;  %v586_v35 = vpop.f32.mrb[28].mxu0 }
 0x18f   : > { %v587_v36 = vadd.f32 %v586_v35, %v1852_v54  ;;  %v588_v37 = vpop.f32.mrb[29].mxu0 }
 0x190   : > { %v590_v38 = vpop.f32.mrb[30].mxu0  ;;  %v589_v41 = vadd.f32 %v588_v37, %v1854_v56 }
 0x191   : > { %706 = vst [vmem:[%s1860_s6 + $0x70] sm:$0xff] %v587_v36  ;;  %v591_v39 = vadd.f32 %v590_v38, %v1852_v54  ;;  %v592_v40 = vpop.f32.mrb[31].mxu0 }
 0x192   : > { %v593_v42 = vadd.f32 %v592_v40, %v1854_v56 }
 0x193   : > { %707 = vst [vmem:[%s1860_s6 + $0x78] sm:$0xff] %v591_v39 }
 0x194   : > { %v1222_v43 = vpack.c.bf16 %v593_v42, %v589_v41 }
 0x195   : > { %1505 = shalt.err (!%p1502_p7)
}
 0x196   : > { %s1506_s6 = scalar_lea.hbm %s1956_s24, 2048  ;;  %s1510_s23 = scalar_lea.hbm %s2085_s3, 4096 }
 0x197   : > { %p1507_p9 = scmp.ne.s32.totalorder %s1956_s24, %s1506_s6  ;;  %p1511_p5 = scmp.lt.u32.totalorder %s1956_s24, %s2085_s3 }
 0x198   : > { %p1512_p11 = scmp.lt.u32.totalorder %s1510_s23, %s1506_s6  ;;  %p1514_p4 = scmp.lt.u32.totalorder %s1506_s6, %s1956_s24 }
 0x199   : > { %p1508_p2 = pnand %p1507_p9, %p1761_p12 }
 0x19a   : > { %p1513_p1 = por %p1512_p11, %p1511_p5 }
 0x19b   : > { %p1509_p0 = pneg %p1508_p2 }
 0x19c   : > { %p1515_p6 = por %p1514_p4, %p1513_p1 }
 0x19e   : > { %p1516_p8 = pnand %p1515_p6, %p1509_p0 }
 0x1a0   : > { %1519 = shalt.err (!%p1516_p8)
}
 0x1a1   : > { %s1632_s17 = smov 128   ;;  %s1633_s13 = smov 8   ;;  %1270 = vst [vmem:[%s1869_s7 + $0x38] sm:$0xff] %v1222_v43  }
 0x1a2   : > { %1332 = dma.vmem_to_hbm [thread:$0]  (%p1761_p12), %s1958_s27, 2048, %s1956_s24, %s869_s28, %s1632_s17, %s1632_s17, %s1633_s13  }
 0x1a3   : > { %s2108_s11 = sshll.u32 %s1888_s16, 4  ;;  %s2109_s6 = sshll.u32 %s1689_s22, 10  ;;  %s1998_s11 = int_to_ptr.vmem [resolvable:$true] %s2108_s11 }
 0x1a4   : > { %s2005_s23 = scalar_lea.hbm %s2087_s5, %s2109_s6  ;;  %s2110_s8 = sand.u32 1, %s1689_s22  }
 0x1a5   : > { %s2010_s0 = scalar_lea.sflag [#allocation9], %s2110_s8  ;;  %s1520_s1 = scalar_lea.vmem %s1944_s14, 1024 }
 0x1a6   : > { %p1521_p10 = scmp.ne.s32.totalorder %s1944_s14, %s1520_s1  ;;  %s1634_s12 = smov [#allocation8]  }
 0x1a7   : > { %s1524_s27 = sshll.u32 %s1634_s12, 4  ;;  %s1525_s27 = int_to_ptr.vmem [resolvable:$false] %s1524_s27 }
 0x1a8   : > { %p1522_p13 = pnand %p1521_p10, %p1761_p12  ;;  %s1526_s16 = scalar_lea.vmem %s1525_s27, 2048 }
 0x1a9   : > { %p1527_p7 = scmp.lt.s32.totalorder %s1944_s14, %s1525_s27  ;;  %p1528_p9 = scmp.lt.s32.totalorder %s1526_s16, %s1520_s1 }
 0x1aa   : > { %p1523_p3 = pneg %p1522_p13 }
 0x1ab   : > { %p1529_p2 = por %p1528_p9, %p1527_p7 }
 0x1ad   : > { %p1530_p0 = pnand %p1529_p2, %p1523_p3 }
 0x1af   : > { %1533 = shalt.err (!%p1530_p0)
}
 0x1b0   : > { %s1534_s22 = scalar_lea.hbm %s1969_s29, 1024  ;;  %s1538_s28 = scalar_lea.hbm %s2086_s4, 2048 }
 0x1b1   : > { %p1535_p5 = scmp.ne.s32.totalorder %s1969_s29, %s1534_s22  ;;  %p1539_p4 = scmp.lt.u32.totalorder %s1969_s29, %s2086_s4 }
 0x1b2   : > { %p1540_p6 = scmp.lt.u32.totalorder %s1538_s28, %s1534_s22  ;;  %p1542_p10 = scmp.lt.u32.totalorder %s1534_s22, %s1969_s29 }
 0x1b3   : > { %p1536_p11 = pnand %p1535_p5, %p1761_p12 }
 0x1b4   : > { %p1541_p8 = por %p1540_p6, %p1539_p4 }
 0x1b5   : > { %p1537_p1 = pneg %p1536_p11 }
 0x1b6   : > { %p1543_p13 = por %p1542_p10, %p1541_p8 }
 0x1b8   : > { %p1544_p3 = pnand %p1543_p13, %p1537_p1 }
 0x1ba   : > { %1547 = shalt.err (!%p1544_p3)
}
 0x1bb   : > { %s1635_s1 = smov 64   ;;  %s1636_s6 = smov 4  }
 0x1bc   : > { %1333 = dma.vmem_to_hbm [thread:$0]  (%p1761_p12), %s1944_s14, 1024, %s1969_s29, %s2010_s0, %s1635_s1, %s1635_s1, %s1636_s6  }
 0x1bd   : > { %s1548_s26 = scalar_lea.vmem %s1998_s11, 1024  ;;  %s1637_s15 = smov [#allocation10]  }
 0x1be   : > { %p1549_p7 = scmp.ne.s32.totalorder %s1998_s11, %s1548_s26  ;;  %s1552_s8 = sshll.u32 %s1637_s15, 4  ;;  %s1553_s8 = int_to_ptr.vmem [resolvable:$false] %s1552_s8 }
 0x1bf   : > { %s1554_s12 = scalar_lea.vmem %s1553_s8, 2048  ;;  %p1555_p0 = scmp.lt.s32.totalorder %s1998_s11, %s1553_s8 }
 0x1c0   : > { %p1550_p9 = pnand %p1549_p7, %p1761_p12  ;;  %p1556_p5 = scmp.lt.s32.totalorder %s1554_s12, %s1548_s26 }
 0x1c2   : > { %p1551_p2 = pneg %p1550_p9  ;;  %p1557_p11 = por %p1556_p5, %p1555_p0 }
 0x1c4   : > { %p1558_p1 = pnand %p1557_p11, %p1551_p2 }
 0x1c6   : > { %1561 = shalt.err (!%p1558_p1)
}
 0x1c7   : > { %s1562_s14 = scalar_lea.hbm %s2005_s23, 1024  ;;  %s1566_s16 = scalar_lea.hbm %s2087_s5, 2048 }
 0x1c8   : > { %p1563_p4 = scmp.ne.s32.totalorder %s2005_s23, %s1562_s14  ;;  %p1567_p10 = scmp.lt.u32.totalorder %s2005_s23, %s2087_s5 }
 0x1c9   : > { %p1568_p13 = scmp.lt.u32.totalorder %s1566_s16, %s1562_s14  ;;  %p1570_p7 = scmp.lt.u32.totalorder %s1562_s14, %s2005_s23 }
 0x1ca   : > { %p1564_p6 = pnand %p1563_p4, %p1761_p12 }
 0x1cb   : > { %p1569_p3 = por %p1568_p13, %p1567_p10 }
 0x1cc   : > { %p1565_p8 = pneg %p1564_p6 }
 0x1cd   : > { %p1571_p9 = por %p1570_p7, %p1569_p3 }
 0x1cf   : > { %p1572_p2 = pnand %p1571_p9, %p1565_p8 }
 0x1d1   : > { %1575 = shalt.err (!%p1572_p2)
}
 0x1d2   : > { %1334 = dma.vmem_to_hbm [thread:$0]  (%p1761_p12), %s1998_s11, 1024, %s2005_s23, %s2010_s0, %s1635_s1, %s1635_s1, %s1636_s6  }
 0x1d3 PF: > { %s939_s24 = sand.u32 1, %s1610_s18   ;;  %p2111_p0 = scmp.ne.s32.totalorder %s2096_s25, 0 }
 0x1d4   : > { %p2112_p5 = scmp.ge.s32.totalorder %s1622_s21, 2  ;;  %s940_s28 = scalar_lea.sflag [#allocation4], %s939_s24 }
 0x1d6   : > { %p1347_p11 = pnand %p2112_p5, %p2111_p0 }
 0x1d8   : > { %1601 = dma.done.wait (!%p1347_p11), %s940_s28, 2048  }
 0x1d9   : > { %1603 = vsyncadd (!%p1347_p11), %s940_s28, 4294965248  ;;  %s2113_s10 = sadd.s32 4294967294, %s1622_s21  }
 0x1da   : > { %s948_s17 = sand.u32 1, %s2113_s10  }
 0x1db   : > { %s949_s13 = scalar_lea.sflag [#allocation9], %s948_s17 }
 0x1dc   : > { %1605 = dma.done.wait (!%p1347_p11), %s949_s13, 2048  }
 0x1dd   : > { %1607 = vsyncadd (!%p1347_p11), %s949_s13, 4294965248  ;;  %p23_p12 = scmp.ge.s32.totalorder %s1726_s30, 4   ;;  %s2114_s18 = smov %s1614_s19 }
 0x1de   : > { %s2115_s19 = smov %s1618_s20  ;;  %s2116_s20 = smov %s1757_s9 }
 0x1df   : > { %s2117_s21 = smov %s1726_s30  ;;  %25 = sbr.rel (!%p23_p12) target bundleno = 11 (0xb), region = 113 }
 0x1e6   :  { %963 = vsyncpa [#allocation3], 1 }
 0x1e7   :  { %965 = vsyncpa [#allocation3 + $0x1], 1 }
 0x1e8   :  { %966 = vsyncpa [#allocation6], 1 }
 0x1e9   :  { %967 = vsyncpa [#allocation4], 1 }
 0x1ea   :  { %969 = vsyncpa [#allocation4 + $0x1], 1 }
 0x1eb   :  { %970 = vsyncpa [#allocation9], 1 }
 0x1ec   :  { %972 = vsyncpa [#allocation9 + $0x1], 1 }

</bundles_post_ra>
